<compile_context>
chip_gen: v7x
topology: tpu7x:2x2x1
jax: 0.10.0
libtpu: 0.0.40
codegen_flags: <defaults>
</compile_context>

<pallas_src>
import math

import jax
import jax.numpy as jnp
from jax.experimental import pallas as pl
from jax.experimental.pallas import tpu as pltpu


_VMEM_BUDGET = 44 * 1024 * 1024      # total per-step tile footprint target
_VMEM_LIMIT_CAP = 48 * 1024 * 1024   # < v7x 64 MiB physical, > v5e/v6e defaults
_F32_TEMPS = 4                       # f32 upcast + select/exp temporaries


def _make_arc_margin_kernel(m: float, s: float, block_b: int, true_b: int):
    cos_m = math.cos(m)
    sin_m = math.sin(m)
    th = math.cos(math.pi - m)
    mm = math.sin(math.pi - m) * m

    def kernel(cos_ref, tgt_ref, cos_t_ref, out_ref):
        i = pl.program_id(0)

        cosine = cos_ref[...].astype(jnp.float32)          # (TB, C)
        tgt = tgt_ref[...]                                  # (TB, 1) int32
        cos_t = cos_t_ref[...].astype(jnp.float32)          # (TB, 1)

        # ArcFace margin math on the (TB, 1) target column only.
        sine_t = jnp.sqrt(jnp.maximum(1.0 - cos_t * cos_t, 0.0))
        phi_t = cos_t * cos_m - sine_t * sin_m
        phi_t = jnp.where(cos_t > th, phi_t, cos_t - mm)

        # (1, C) class-index row broadcast-compared against the target column
        # (no full-tile iota regenerated every grid step).
        cls_row = jax.lax.broadcasted_iota(jnp.int32, (1, cosine.shape[1]), 1)
        is_tgt = cls_row == tgt                             # (TB, C) bool

        # Numerically-stable logsumexp with shift = s * max(cosine): this is a
        # valid upper bound of every logit (phi_t <= cos_t <= max(cosine); the
        # non-target logits are s*cosine), so the logits are consumed by one
        # select->mul->sub->exp->sum chain instead of a max pass plus an exp
        # pass over a materialised full-tile `logits` temporary.
        shift = jnp.max(cosine, axis=-1, keepdims=True) * s          # (TB, 1)
        p = jnp.exp(jnp.where(is_tgt, phi_t, cosine) * s - shift)    # (TB, C)
        sum_exp = jnp.sum(p, axis=-1, keepdims=True)                 # (TB, 1)
        # TODO(synk): if bundle dumps still show VALU as the binding slot on
        # v7x, offload this lane reduction to the idle MXU via
        # jnp.dot(p, ones((C, 1)), preferred_element_type=f32).

        # Per-row cross-entropy: logsumexp(logits) - logits[target].
        loss_col = shift + jnp.log(sum_exp) - phi_t * s              # (TB, 1)

        # Mask padding rows past the true batch size.
        row_ids = i * block_b + jax.lax.broadcasted_iota(
            jnp.int32, (block_b, 1), 0)
        loss_col = jnp.where(row_ids < true_b, loss_col, 0.0)

        # Lane-dense per-tile partial sum; reduced (and divided by B) in the
        # wrapper so the batch grid axis stays fully parallel (v7x megacore).
        tile_sum = jnp.sum(loss_col, axis=0, keepdims=True)          # (1, 1)
        out_ref[...] = jnp.broadcast_to(tile_sum.reshape(1, 1, 1),
                                        out_ref.shape)

    return kernel


def _choose_block_b(b: int, c: int, itemsize: int) -> int:
    """Byte-capped batch tile (no fixed row cap): size against the total VMEM
    footprint (double-buffered input tile + f32 elementwise temporaries), so
    f32 inputs get ~8 MiB raw tiles and bf16 ~5 MiB on every chip."""
    sub = 16 if itemsize < 4 else 8          # sublane multiple (packed bf16: 16)
    per_row = c * (2 * itemsize + _F32_TEMPS * 4)
    rows = max(sub, _VMEM_BUDGET // max(per_row, 1))
    rows = max(sub, (rows // sub) * sub)
    b_pad = ((b + sub - 1) // sub) * sub
    return int(min(rows, b_pad))


def arc_margin_cross_entropy(cosine, target, *, m=0.5, s=30.0, block_b=None):
    """cosine: (B, C) float32/bfloat16, target: (B,) int -> scalar mean CE loss."""
    B, C = cosine.shape
    itemsize = jnp.dtype(cosine.dtype).itemsize
    tb = int(block_b) if block_b is not None else _choose_block_b(B, C, itemsize)

    num_tiles = -(-B // tb)
    b_pad = num_tiles * tb

    target = target.astype(jnp.int32)
    # Gather the target-column cosine once in the wrapper (tiny XLA gather) so
    # the kernel doesn't spend a full-tile select + lane-reduce extracting it.
    cos_t = jnp.take_along_axis(cosine, target[:, None], axis=1)      # (B, 1)

    if b_pad != B:
        cosine = jnp.pad(cosine, ((0, b_pad - B), (0, 0)))
        target = jnp.pad(target, (0, b_pad - B))
        cos_t = jnp.pad(cos_t, ((0, b_pad - B), (0, 0)))
    tgt2d = target.reshape(b_pad, 1)

    kernel = _make_arc_margin_kernel(m, s, tb, B)

    # VMEM budget: double-buffered input tile + f32 temporaries (+ headroom),
    # capped under v7x's 64 MiB physical VMEM and raised past the v5e/v6e
    # scoped defaults when larger tiles are worthwhile.
    est_vmem = tb * C * (2 * itemsize + _F32_TEMPS * 4) + (2 << 20)
    vmem_limit = int(min(max(est_vmem, 16 * 1024 * 1024), _VMEM_LIMIT_CAP))

    cost = pl.CostEstimate(
        flops=6 * B * C,
        transcendentals=B * C,
        bytes_accessed=B * C * itemsize + B * (4 + itemsize)
        + num_tiles * 8 * 128 * 4,
    )

    # TODO(synk): biggest structural win (interface permitting) is fusing the
    # producing matmul feats @ weights.T into this kernel so the (B, C) cosine
    # matrix never round-trips HBM.
    # TODO(synk): for class counts where even an 8-row tile exceeds VMEM, add
    # a second "arbitrary" grid axis over C with an online-logsumexp carry.
    out = pl.pallas_call(
        kernel,
        out_shape=jax.ShapeDtypeStruct((num_tiles, 8, 128), jnp.float32),
        grid_spec=pltpu.PrefetchScalarGridSpec(
            num_scalar_prefetch=0,
            grid=(num_tiles,),
            in_specs=[
                pl.BlockSpec((tb, C), lambda i: (i, 0)),
                pl.BlockSpec((tb, 1), lambda i: (i, 0)),
                pl.BlockSpec((tb, 1), lambda i: (i, 0)),
            ],
            out_specs=pl.BlockSpec((1, 8, 128), lambda i: (i, 0, 0)),
        ),
        compiler_params=pltpu.CompilerParams(
            # Each grid step owns its own output block — no carried state — so
            # the batch axis is parallel (shards across both v7x TensorCores).
            dimension_semantics=("parallel",),
            vmem_limit_bytes=vmem_limit,
        ),
        cost_estimate=cost,
    )(cosine, tgt2d, cos_t)

    # Final reduction over the tiny (num_tiles,) partial-sum vector.
    return jnp.sum(out[:, 0, 0]) / jnp.float32(B)


def _reference(cosine, target, m=0.5, s=30.0):
    """Pure-JAX reference mirroring the PyTorch module."""
    cos_m, sin_m = math.cos(m), math.sin(m)
    th = math.cos(math.pi - m)
    mm = math.sin(math.pi - m) * m
    sine = jnp.sqrt(jnp.maximum(1.0 - cosine ** 2, 0.0))
    phi = cosine * cos_m - sine * sin_m
    phi = jnp.where(cosine > th, phi, cosine - mm)
    one_hot = jax.nn.one_hot(target, cosine.shape[1], dtype=cosine.dtype)
    logits = (one_hot * phi + (1.0 - one_hot) * cosine) * s
    logp = jax.nn.log_softmax(logits, axis=-1)
    return -jnp.mean(jnp.sum(one_hot * logp, axis=-1))


if __name__ == "__main__":
    key = jax.random.PRNGKey(0)
    # Small demo shapes: C lane-aligned; B chosen NOT to be a tile multiple so
    # the padding/masking path is exercised.
    B, C = 12, 256

    k1, k2 = jax.random.split(key)
    feats = jax.random.normal(k1, (B, 32), dtype=jnp.float32)
    weights = jax.random.normal(k2, (C, 32), dtype=jnp.float32)
    feats = feats / jnp.linalg.norm(feats, axis=-1, keepdims=True)
    weights = weights / jnp.linalg.norm(weights, axis=-1, keepdims=True)
    cosine = jnp.clip(feats @ weights.T, -1.0, 1.0)
    target = jax.random.randint(jax.random.PRNGKey(42), (B,), 0, C,
                                dtype=jnp.int32)

    ref = _reference(cosine, target)

    # Default (single-tile) path.
    loss = arc_margin_cross_entropy(cosine, target)
    jax.block_until_ready(loss)
    assert jnp.allclose(loss, ref, atol=1e-4, rtol=1e-4), (loss, ref)

    # Multi-tile grid (2 parallel tiles + masked padding rows) to exercise the
    # per-tile partial-sum path.
    loss_tiled = arc_margin_cross_entropy(cosine, target, block_b=8)
    jax.block_until_ready(loss_tiled)
    assert jnp.allclose(loss_tiled, ref, atol=1e-4, rtol=1e-4), (loss_tiled, ref)

    # bf16 streaming path (halves HBM bytes on v5e/v6e; kernel math stays f32).
    cos_bf16 = cosine.astype(jnp.bfloat16)
    ref_bf16 = _reference(cos_bf16.astype(jnp.float32), target)
    loss_bf16 = arc_margin_cross_entropy(cos_bf16, target)
    jax.block_until_ready(loss_bf16)
    assert jnp.allclose(loss_bf16, ref_bf16, atol=1e-3, rtol=1e-3), (
        loss_bf16, ref_bf16)

    print("KERNEL_OK")
</pallas_src>

<mosaic_0001>
module attributes {stable_mosaic.version = 11 : i64} {
  func.func @kernel(%arg0: i32, %arg1: memref<16x256xf32, #tpu.memory_space<vmem>>, %arg2: memref<16x1xi32, #tpu.memory_space<vmem>>, %arg3: memref<16x1xf32, #tpu.memory_space<vmem>>, %arg4: memref<1x8x128xf32, #tpu.memory_space<vmem>>) attributes {dimension_semantics = [#tpu.dimension_semantics<parallel>], iteration_bounds = array<i64: 1>, scalar_prefetch = 0 : i64, scratch_operands = 0 : i64, tpu.core_type = #tpu.core_type<tc>, window_params = [{transform_indices = @transform_0, window_bounds = array<i64: 16, 256>}, {transform_indices = @transform_1, window_bounds = array<i64: 16, 1>}, {transform_indices = @transform_2, window_bounds = array<i64: 16, 1>}, {transform_indices = @transform_3, window_bounds = array<i64: 1, 8, 128>}]} {
    %c0 = arith.constant 0 : index
    %c0_0 = arith.constant 0 : index
    %0 = vector.load %arg1[%c0, %c0_0] : memref<16x256xf32, #tpu.memory_space<vmem>>, vector<16x256xf32>
    %c0_1 = arith.constant 0 : index
    %c0_2 = arith.constant 0 : index
    %1 = vector.load %arg2[%c0_1, %c0_2] : memref<16x1xi32, #tpu.memory_space<vmem>>, vector<16x1xi32>
    %c0_3 = arith.constant 0 : index
    %c0_4 = arith.constant 0 : index
    %2 = vector.load %arg3[%c0_3, %c0_4] : memref<16x1xf32, #tpu.memory_space<vmem>>, vector<16x1xf32>
    %3 = arith.mulf %2, %2 : vector<16x1xf32>
    %cst = arith.constant 1.000000e+00 : f32
    %4 = vector.broadcast %cst : f32 to vector<16x1xf32>
    %5 = arith.subf %4, %3 : vector<16x1xf32>
    %cst_5 = arith.constant 0.000000e+00 : f32
    %6 = vector.broadcast %cst_5 : f32 to vector<16x1xf32>
    %7 = arith.maximumf %5, %6 : vector<16x1xf32>
    %8 = math.sqrt %7 : vector<16x1xf32>
    %cst_6 = arith.constant 0.87758255 : f32
    %9 = vector.broadcast %cst_6 : f32 to vector<16x1xf32>
    %10 = arith.mulf %2, %9 : vector<16x1xf32>
    %cst_7 = arith.constant 0.47942555 : f32
    %11 = vector.broadcast %cst_7 : f32 to vector<16x1xf32>
    %12 = arith.mulf %8, %11 : vector<16x1xf32>
    %13 = arith.subf %10, %12 : vector<16x1xf32>
    %cst_8 = arith.constant -0.87758255 : f32
    %14 = vector.broadcast %cst_8 : f32 to vector<16x1xf32>
    %15 = arith.cmpf ogt, %2, %14 : vector<16x1xf32>
    %cst_9 = arith.constant 0.239712775 : f32
    %16 = vector.broadcast %cst_9 : f32 to vector<16x1xf32>
    %17 = arith.subf %2, %16 : vector<16x1xf32>
    %18 = arith.select %15, %13, %17 : vector<16x1xi1>, vector<16x1xf32>
    %19 = tpu.iota {dimensions = array<i32: 1>} : vector<1x256xi32>
    %20 = vector.broadcast %19 : vector<1x256xi32> to vector<16x256xi32>
    %21 = vector.broadcast %1 : vector<16x1xi32> to vector<16x256xi32>
    %22 = arith.cmpi eq, %20, %21 : vector<16x256xi32>
    %cst_10 = arith.constant dense<0xFF800000> : vector<16xf32>
    %23 = vector.multi_reduction <maximumf>, %0, %cst_10 [1] : vector<16x256xf32> to vector<16xf32>
    %24 = vector.shape_cast %23 : vector<16xf32> to vector<16x1xf32>
    %cst_11 = arith.constant 3.000000e+01 : f32
    %25 = vector.broadcast %cst_11 : f32 to vector<16x1xf32>
    %26 = arith.mulf %24, %25 : vector<16x1xf32>
    %27 = vector.shape_cast %18 : vector<16x1xf32> to vector<16x1xf32>
    %28 = vector.broadcast %27 : vector<16x1xf32> to vector<16x256xf32>
    %29 = arith.select %22, %28, %0 : vector<16x256xi1>, vector<16x256xf32>
    %cst_12 = arith.constant 3.000000e+01 : f32
    %30 = vector.broadcast %cst_12 : f32 to vector<16x256xf32>
    %31 = arith.mulf %29, %30 : vector<16x256xf32>
    %32 = vector.broadcast %26 : vector<16x1xf32> to vector<16x256xf32>
    %33 = arith.subf %31, %32 : vector<16x256xf32>
    %34 = math.exp %33 : vector<16x256xf32>
    %cst_13 = arith.constant dense<0.000000e+00> : vector<16xf32>
    %35 = vector.multi_reduction <add>, %34, %cst_13 [1] : vector<16x256xf32> to vector<16xf32>
    %36 = vector.shape_cast %35 : vector<16xf32> to vector<16x1xf32>
    %37 = math.log %36 : vector<16x1xf32>
    %38 = arith.addf %26, %37 : vector<16x1xf32>
    %cst_14 = arith.constant 3.000000e+01 : f32
    %39 = vector.broadcast %cst_14 : f32 to vector<16x1xf32>
    %40 = arith.mulf %18, %39 : vector<16x1xf32>
    %41 = arith.subf %38, %40 : vector<16x1xf32>
    %c16_i32 = arith.constant 16 : i32
    %42 = arith.muli %arg0, %c16_i32 : i32
    %43 = tpu.iota {dimensions = array<i32: 0>} : vector<16x1xi32>
    %44 = vector.broadcast %42 : i32 to vector<16x1xi32>
    %45 = arith.addi %44, %43 : vector<16x1xi32>
    %c12_i32 = arith.constant 12 : i32
    %46 = vector.broadcast %c12_i32 : i32 to vector<16x1xi32>
    %47 = arith.cmpi slt, %45, %46 : vector<16x1xi32>
    %cst_15 = arith.constant 0.000000e+00 : f32
    %48 = vector.broadcast %cst_15 : f32 to vector<16x1xf32>
    %49 = arith.select %47, %41, %48 : vector<16x1xi1>, vector<16x1xf32>
    %cst_16 = arith.constant dense<0.000000e+00> : vector<1xf32>
    %50 = vector.multi_reduction <add>, %49, %cst_16 [0] : vector<16x1xf32> to vector<1xf32>
    %51 = vector.shape_cast %50 : vector<1xf32> to vector<1x1xf32>
    %52 = vector.shape_cast %51 : vector<1x1xf32> to vector<1x1x1xf32>
    %53 = vector.shape_cast %52 : vector<1x1x1xf32> to vector<1x1x1xf32>
    %54 = vector.broadcast %53 : vector<1x1x1xf32> to vector<1x8x128xf32>
    %c0_17 = arith.constant 0 : index
    %c0_18 = arith.constant 0 : index
    %c0_19 = arith.constant 0 : index
    %55 = vector.load %arg4[%c0_17, %c0_18, %c0_19] : memref<1x8x128xf32, #tpu.memory_space<vmem>>, vector<1x8x128xf32>
    tpu.vector_store %arg4[%c0_17, %c0_18, %c0_19], %54 {strides = array<i32>} : memref<1x8x128xf32, #tpu.memory_space<vmem>>, vector<1x8x128xf32>,
    return
  }
  func.func @transform_0(%arg0: i32) -> (i32, i32) {
    %c0_i32 = arith.constant 0 : i32
    %c0_i32_0 = arith.constant 0 : i32
    return %arg0, %c0_i32 : i32, i32
  }
  func.func @transform_1(%arg0: i32) -> (i32, i32) {
    %c0_i32 = arith.constant 0 : i32
    %c0_i32_0 = arith.constant 0 : i32
    return %arg0, %c0_i32 : i32, i32
  }
  func.func @transform_2(%arg0: i32) -> (i32, i32) {
    %c0_i32 = arith.constant 0 : i32
    %c0_i32_0 = arith.constant 0 : i32
    return %arg0, %c0_i32 : i32, i32
  }
  func.func @transform_3(%arg0: i32) -> (i32, i32, i32) {
    %c0_i32 = arith.constant 0 : i32
    %c0_i32_0 = arith.constant 0 : i32
    %c0_i32_1 = arith.constant 0 : i32
    return %arg0, %c0_i32, %c0_i32_0 : i32, i32, i32
  }
}

</mosaic_0001>

<bundles_post_ra>
// kernel: tpu_custom_call.1
= control target key start
LH: loop header
LB: loop body
LE: loop exit
PB: predicated region body
PF: predicated region fallthrough
CT: control target
= control target key end

     0   :  { %v209_v5 = vmov 0   ;;  %s283_s0 = inlined_call_operand.vmem [shape: f32[16,256], index: 0, kind: input, shape index: {}]   ;;  %s284_s1 = inlined_call_operand.vmem [shape: s32[16,1], index: 1, kind: input, shape index: {}]   ;;  %s285_s2 = inlined_call_operand.vmem [shape: f32[16,1], index: 2, kind: input, shape index: {}]   ;;  %s286_s3 = inlined_call_operand.hbm [shape: f32[1,8,128], index: 3, kind: output, shape index: {}]  }
   0x1   :  { %v234_v0 = vld [vmem:[%s283_s0 + $0x10] sm:$0xff]  ;;  %v239_v1 = vld [vmem:[%s283_s0 + $0x18] sm:$0xff]  ;;  %v244_v2 = vld [vmem:[%s283_s0] sm:$0xff]  ;;  %167 = vset.pattern.permute.xlu1 %v209_v5  ;;  %168 = vset.pattern.permute.xlu0 %v209_v5 }
   0x2   :  { %v71_v3 = vmax.f32 %v234_v0, %v239_v1  ;;  %v251_v4 = vld [vmem:[%s283_s0 + $0x8] sm:$0xff]  ;;  %v21_v7 = vld [vmem:[%s285_s2] sm:$0xff] }
   0x3   :  { %v20_v6 = vld [vmem:[%s284_s1 + $0x8] sm:$0xff] }
   0x4   :  { %62 = vperm.xlu1 %167, %v20_v6   ;;  %v22_v8 = vld [vmem:[%s285_s2 + $0x8] sm:$0xff] }
   0x5   :  { %8 = vsyncpa [#allocation3], 0  ;;  %72 = vmax.xlane.f32.xlu0 %v71_v3  ;;  %v68_v9 = vmax.f32 %v244_v2, %v251_v4  ;;  %v19_v10 = vld [vmem:[%s284_s1] sm:$0xff]  ;;  %v23_v11 = vmul.f32 %v21_v7, %v21_v7  ;;  %v24_v12 = vmul.f32 %v22_v8, %v22_v8  ;;  %v43_v24 = vmul.f32 0.87758255, %v21_v7  ;;  %s210_s1 = smov [#allocation2]  }
   0x6   :  { %v44_v27 = vmul.f32 0.87758255, %v22_v8  ;;  %v163_v29 = vadd.f32 -0.23971277, %v21_v7  ;;  %vm49_vm4 = vcmp.gt.f32.partialorder %v21_v7, -0.87758255  ;;  %v55_v37 = vlaneseq }
   0x7   :  { %v25_v13 = vsub.f32 1.0, %v23_v11  ;;  %v26_v14 = vsub.f32 1.0, %v24_v12  ;;  %v164_v32 = vadd.f32 -0.23971277, %v22_v8  ;;  %vm50_vm5 = vcmp.gt.f32.partialorder %v22_v8, -0.87758255 }
   0x8   :  { %59 = vperm.xlu1 %167, %v19_v10   ;;  %v56_v39 = vand.u32 127, %v55_v37  ;;  %v124_v8 = vshrl.u32 %v55_v37, 7  ;;  %vm133_vm11 = vcmask 7168   ;;  %s155_s2 = sshll.u32 %s210_s1, 4  ;;  %s156_s2 = int_to_ptr.vmem [resolvable:$true] %s155_s2 }
   0x9   :  { %69 = vmax.xlane.f32.xlu0 %v68_v9  ;;  %v27_v15 = vmax.f32 %v25_v13, 0.0  ;;  %v28_v16 = vmax.f32 %v26_v14, 0.0  ;;  %s185_s27 = scalar_lea.vmem %s156_s2, 128  ;;  %p190_p1 = scmp.lt.s32.totalorder %s156_s2, %s156_s2 }
   0xa   :  { %v57_v41 = vadd.s32 128, %v56_v39  ;;  %v125_v10 = vadd.s32 8, %v124_v8  ;;  %p186_p0 = scmp.ne.s32.totalorder %s156_s2, %s185_s27  ;;  %p191_p2 = scmp.lt.s32.totalorder %s185_s27, %s185_s27 }
   0xb   :  { %169 = vrsqrt.f32 %v27_v15  ;;  %vm31_vm0 = vcmp.eq.f32.partialorder %v27_v15, inf  ;;  %v34_v18 = vand.u32 2147483648, %v27_v15  ;;  %vm33_vm1 = vcmp.eq.f32.partialorder %v27_v15, 0.0 }
   0xc   :  { %171 = vrsqrt.f32 %v28_v16  ;;  %vm38_vm2 = vcmp.eq.f32.partialorder %v28_v16, inf  ;;  %v41_v21 = vand.u32 2147483648, %v28_v16  ;;  %vm40_vm3 = vcmp.eq.f32.partialorder %v28_v16, 0.0  ;;  %p192_p3 = por %p191_p2, %p190_p1 }
   0xd   :  { %vm130_vm10 = vcmp.lt.s32.totalorder %v125_v10, 12 }
   0xe   :  { %p193_p4 = pnand %p192_p3, %p186_p0 }
  0x15   :  { %v170_v17 = vpop.eup %169 }
  0x16   :  { %v172_v19 = vpop.eup %171  ;;  %v30_v20 = vmul.f32 %v170_v17, %v27_v15 }
  0x17   :  { %v37_v22 = vmul.f32 %v172_v19, %v28_v16 }
  0x18   :  { %v32_v23 = vsel %vm31_vm0, %v27_v15, %v30_v20 }
  0x19   :  { %v35_v25 = vsel %vm33_vm1, %v34_v18, %v32_v23  ;;  %v39_v26 = vsel %vm38_vm2, %v28_v16, %v37_v22 }
  0x1a   :  { %v45_v28 = vmul.f32 0.47942555, %v35_v25  ;;  %v42_v30 = vsel %vm40_vm3, %v41_v21, %v39_v26 }
  0x1b   :  { %v46_v31 = vmul.f32 0.47942555, %v42_v30 }
  0x1c   :  { %v47_v33 = vsub.f32 %v43_v24, %v45_v28 }
  0x1d   :  { %v48_v34 = vsub.f32 %v44_v27, %v46_v31 }
  0x1e   :  { %v53_v35 = vsel %vm49_vm4, %v47_v33, %v163_v29 }
  0x1f   :  { %78 = vperm.xlu1 %167, %v53_v35   ;;  %v54_v36 = vsel %vm50_vm5, %v48_v34, %v164_v32  ;;  %v118_v15 = vmul.f32 30.0, %v53_v35 }
  0x20   :  { %83 = vperm.xlu0 %168, %v54_v36   ;;  %v119_v11 = vmul.f32 30.0, %v54_v36 }
  0x83   :  { %v63_v38 = vpop.permute.xlu1 %62 }
  0x84   :  { %vm66_vm8 = vcmp.eq.s32.totalorder %v56_v39, %v63_v38  ;;  %vm67_vm9 = vcmp.eq.s32.totalorder %v57_v41, %v63_v38 }
  0x87   :  { %v60_v42 = vpop.permute.xlu1 %59 }
  0x88   :  { %vm64_vm6 = vcmp.eq.s32.totalorder %v56_v39, %v60_v42  ;;  %vm65_vm7 = vcmp.eq.s32.totalorder %v57_v41, %v60_v42 }
  0x92   :  { %v73_v40 = vpop.xlane.xlu0 %72 }
  0x93   :  { %v75_v53 = vmul.f32 30.0, %v73_v40 }
  0x96   :  { %v70_v43 = vpop.xlane.xlu0 %69 }
  0x97   :  { %v74_v45 = vmul.f32 30.0, %v70_v43 }
  0x9e   :  { %v79_v44 = vpop.permute.xlu1 %78 }
  0x9f   :  { %v86_v46 = vsel %vm64_vm6, %v79_v44, %v244_v2  ;;  %v87_v47 = vsel %vm65_vm7, %v79_v44, %v251_v4  ;;  %v84_v48 = vpop.permute.xlu0 %83 }
  0xa0   :  { %v90_v49 = vmul.f32 30.0, %v86_v46  ;;  %v91_v50 = vmul.f32 30.0, %v87_v47  ;;  %v88_v51 = vsel %vm66_vm8, %v84_v48, %v234_v0  ;;  %v89_v52 = vsel %vm67_vm9, %v84_v48, %v239_v1 }
  0xa1   :  { %v92_v54 = vmul.f32 30.0, %v88_v51  ;;  %v93_v55 = vmul.f32 30.0, %v89_v52 }
  0xa2   :  { %v94_v56 = vsub.f32 %v90_v49, %v74_v45  ;;  %v95_v57 = vsub.f32 %v91_v50, %v74_v45 }
  0xa3   :  { %v96_v58 = vsub.f32 %v92_v54, %v75_v53  ;;  %v97_v59 = vsub.f32 %v93_v55, %v75_v53 }
  0xa4   :  { %v98_v62 = vmul.f32 1.442695, %v94_v56  ;;  %v100_v63 = vmul.f32 1.442695, %v95_v57 }
  0xa5   :  { %v102_v60 = vmul.f32 1.442695, %v96_v58  ;;  %v104_v61 = vmul.f32 1.442695, %v97_v59 }
  0xa7   :  { %173 = vpow2.f32 %v102_v60 }
  0xa8   :  { %175 = vpow2.f32 %v104_v61 }
  0xa9   :  { %177 = vpow2.f32 %v98_v62 }
  0xaa   :  { %179 = vpow2.f32 %v100_v63 }
  0xb1   :  { %v174_v2 = vpop.eup %173 }
  0xb2   :  { %v176_v3 = vpop.eup %175 }
  0xb3   :  { %v178_v0 = vpop.eup %177  ;;  %v109_v4 = vadd.f32 %v176_v3, %v174_v2 }
  0xb4   :  { %v180_v1 = vpop.eup %179 }
  0xb5   :  { %110 = vadd.xlane.f32.xlu1 %v109_v4  ;;  %v106_v5 = vadd.f32 %v180_v1, %v178_v0 }
  0xb9   :  { %107 = vadd.xlane.f32.xlu1 %v106_v5 }
 0x142   :  { %v111_v6 = vpop.xlane.xlu1 %110 }
 0x143   :  { %181 = vlog2.f32 %v111_v6 }
 0x146   :  { %v108_v7 = vpop.xlane.xlu1 %107 }
 0x147   :  { %183 = vlog2.f32 %v108_v7 }
 0x14d   :  { %v182_v9 = vpop.eup %181 }
 0x14e   :  { %v115_v12 = vmul.f32 0.6931472, %v182_v9 }
 0x150   :  { %v117_v13 = vadd.f32 %v115_v12, %v75_v53 }
 0x151   :  { %v184_v14 = vpop.eup %183 }
 0x152   :  { %v121_v16 = vsub.f32 %v117_v13, %v119_v11  ;;  %v113_v17 = vmul.f32 0.6931472, %v184_v14 }
 0x154   :  { %v132_v18 = vsel %vm130_vm10, %v121_v16, 0.0  ;;  %v116_v19 = vadd.f32 %v113_v17, %v74_v45 }
 0x155   :  { %v135_v21 = vsel %vm133_vm11, %v132_v18, 0.0 }
 0x156   :  { %v120_v20 = vsub.f32 %v116_v19, %v118_v15 }
 0x158   :  { %v134_v22 = vsel %vm133_vm11, %v120_v20, 0.0 }
 0x159   :  { %v136_v23 = vadd.f32 %v135_v21, %v134_v22 }
 0x15b   :  { %v137_v24 = vrot.slane %v136_v23, 4 }
 0x15d   :  { %v138_v25 = vadd.f32 %v137_v24, %v136_v23 }
 0x15f   :  { %v139_v26 = vrot.slane %v138_v25, 2 }
 0x161   :  { %v140_v27 = vadd.f32 %v139_v26, %v138_v25 }
 0x163   :  { %v141_v28 = vrot.slane %v140_v27, 1 }
 0x165   :  { %v142_v29 = vadd.f32 %v141_v28, %v140_v27 }
 0x167   :  { %145 = vperm.xlu0 %168, %v142_v29  }
 0x1e6   :  { %v146_v30 = vpop.permute.xlu0 %145 }
 0x1e7   :  { %148 = vst [vmem:[#allocation2] sm:$0xff] %v146_v30 }
 0x1e8   :  { %196 = shalt.err (!%p193_p4)
}
 0x1e9   :  { %s197_s30 = scalar_lea.hbm %s286_s3, 128 }
 0x1ea   :  { %p198_p5 = scmp.ne.s32.totalorder %s286_s3, %s197_s30  ;;  %p201_p6 = scmp.lt.u32.totalorder %s197_s30, %s286_s3 }
 0x1ec   :  { %p203_p7 = pnand %p201_p6, %p198_p5 }
 0x1ee   :  { %206 = shalt.err (!%p203_p7)
}
 0x1ef   :  { %158 = dma.vmem_to_hbm [thread:$0]  %s156_s2, 128, %s286_s3, [#allocation3]  }
 0x1f0   :  { %207 = dma.done.wait [#allocation3], 128  }
 0x1f1   :  { %208 = vsyncadd [#allocation3], 4294967168 }
 0x1f2   :  { %162 = vsyncpa [#allocation3], 1 }

</bundles_post_ra>
